<compile_context>
chip_gen: v7x
topology: tpu7x:2x2x1
jax: 0.10.0
libtpu: 0.0.40
codegen_flags: <defaults>
</compile_context>

<pallas_src>
import jax
import jax.numpy as jnp
from jax.experimental import pallas as pl
from jax.experimental.pallas import tpu as pltpu

FEATURE_DIM = 256
HIDDEN1 = 512
HIDDEN2 = 256
NUM_STRATEGIES = 5
LANE_OUT = 128          # lane-dense padded width for the 5-way logits / softmax
OUT_PAD = 8             # stored output columns (5 real + 3 zero pad)
NEG_BIG = -1e30         # bias on padded logit columns -> exp() underflows to 0


def _round_up(n, m):
    return ((n + m - 1) // m) * m


def _choose_tb(batch, tb_max):
    """Batch-tile: multiple of 8 rows, capped at tb_max, and >= 2 grid steps
    whenever the batch is big enough (keeps both v7x TensorCores busy)."""
    half = _round_up(max(pl.cdiv(batch, 2), 1), 8)
    return max(8, min(_round_up(tb_max, 8), half))


def strategy_selector_kernel(x_ref, w1_ref, b1_ref, w2_ref, b2_ref,
                             w3_ref, b3_ref, o_ref):
    # Layer 1: Linear(256 -> 512) + ReLU  (bf16 MXU operands, f32 accumulation;
    # Dropout is identity at inference).
    x = x_ref[...].astype(jnp.bfloat16)
    h1 = jnp.dot(x, w1_ref[...], preferred_element_type=jnp.float32) + b1_ref[...]
    h1 = jnp.maximum(h1, 0.0)

    # Layer 2: Linear(512 -> 256) + ReLU
    h2 = jnp.dot(h1.astype(jnp.bfloat16), w2_ref[...],
                 preferred_element_type=jnp.float32) + b2_ref[...]
    h2 = jnp.maximum(h2, 0.0)

    # Layer 3: Linear(256 -> 128 padded).  Padded columns have zero weights and
    # a -1e30 bias, so they contribute nothing to the softmax.
    logits = jnp.dot(h2.astype(jnp.bfloat16), w3_ref[...],
                     preferred_element_type=jnp.float32) + b3_ref[...]

    # Numerically stable softmax over the lane-dense 128-wide row.
    m = jnp.max(logits, axis=-1, keepdims=True)
    e = jnp.exp(logits - m)
    s = jnp.sum(e, axis=-1, keepdims=True)
    probs = e * pl.reciprocal(s, approx=True)

    # Store only the 8 leading columns (5 real strategies + 3 exact zeros):
    # 16x less HBM writeback than the padded 128-lane f32 slab.
    o_ref[...] = probs[:, :OUT_PAD]


def prepare_params(w1, b1, w2, b2, w3, b3):
    """One-time parameter prep (hoisted out of the per-call forward):
    bf16 casts for the MXU operands and lane-dense padding of the 5-way head."""
    w1b = w1.astype(jnp.bfloat16)
    w2b = w2.astype(jnp.bfloat16)
    w3p = (jnp.zeros((HIDDEN2, LANE_OUT), jnp.float32)
           .at[:, :NUM_STRATEGIES].set(w3).astype(jnp.bfloat16))
    b3p = (jnp.full((1, LANE_OUT), NEG_BIG, jnp.float32)
           .at[:, :NUM_STRATEGIES].set(b3))
    return w1b, b1, w2b, b2, w3p, b3p


def strategy_selector_forward(x, w1b, b1, w2b, b2, w3p, b3p, tb_max=1024):
    """x: [B, FEATURE_DIM] f32; prepared params from prepare_params();
    returns [B, NUM_STRATEGIES] probabilities."""
    B = x.shape[0]
    tb = _choose_tb(B, tb_max)
    grid = (pl.cdiv(B, tb),)          # ragged last block handled by Pallas

    const = lambda i: (0, 0)          # weights/biases: same (only) block every step

    out = pl.pallas_call(
        strategy_selector_kernel,
        out_shape=jax.ShapeDtypeStruct((B, OUT_PAD), jnp.float32),
        grid=grid,
        in_specs=[
            pl.BlockSpec((tb, FEATURE_DIM), lambda i: (i, 0)),   # x tile
            pl.BlockSpec((FEATURE_DIM, HIDDEN1), const),         # w1 (resident)
            pl.BlockSpec((1, HIDDEN1), const),                   # b1
            pl.BlockSpec((HIDDEN1, HIDDEN2), const),             # w2
            pl.BlockSpec((1, HIDDEN2), const),                   # b2
            pl.BlockSpec((HIDDEN2, LANE_OUT), const),            # w3 (padded)
            pl.BlockSpec((1, LANE_OUT), const),                  # b3 (padded)
        ],
        out_specs=pl.BlockSpec((tb, OUT_PAD), lambda i: (i, 0)),
        compiler_params=pltpu.CompilerParams(
            dimension_semantics=("parallel",),
        ),
    )(x, w1b, b1, w2b, b2, w3p, b3p)

    # Drop the 3 zero pad columns.
    return out[:, :NUM_STRATEGIES]


def init_params(key):
    """Deterministic synthetic params; shapes match the nn.Sequential layers."""
    k1, k2, k3, k4, k5, k6 = jax.random.split(key, 6)

    def linear_init(kw, kb, fan_in, fan_out):
        # PyTorch-style uniform(-1/sqrt(fan_in), 1/sqrt(fan_in))
        bound = 1.0 / jnp.sqrt(fan_in)
        w = jax.random.uniform(kw, (fan_in, fan_out), jnp.float32, -bound, bound)
        b = jax.random.uniform(kb, (1, fan_out), jnp.float32, -bound, bound)
        return w, b

    w1, b1 = linear_init(k1, k2, FEATURE_DIM, HIDDEN1)
    w2, b2 = linear_init(k3, k4, HIDDEN1, HIDDEN2)
    w3, b3 = linear_init(k5, k6, HIDDEN2, NUM_STRATEGIES)
    return w1, b1, w2, b2, w3, b3


def reference_forward(x, w1, b1, w2, b2, w3, b3):
    """Pure-JAX f32 reference of the PyTorch forward (dropout off)."""
    h1 = jnp.maximum(x @ w1 + b1, 0.0)
    h2 = jnp.maximum(h1 @ w2 + b2, 0.0)
    return jax.nn.softmax(h2 @ w3 + b3, axis=-1)


if __name__ == "__main__":
    key = jax.random.PRNGKey(0)
    k_x, k_x2, k_p = jax.random.split(key, 3)

    params = init_params(k_p)
    prepped = prepare_params(*params)   # one-time weight prep (hoisted)

    # Small primary test batch.
    B = 8
    x = jax.random.normal(k_x, (B, FEATURE_DIM), jnp.float32)
    probs = jax.block_until_ready(strategy_selector_forward(x, *prepped))

    ref = reference_forward(x, *params)
    row_sums = jnp.sum(probs, axis=-1)
    assert probs.shape == (B, NUM_STRATEGIES)
    assert bool(jnp.all(jnp.abs(row_sums - 1.0) < 5e-3))
    assert bool(jnp.max(jnp.abs(probs - ref)) < 2e-2)

    # Secondary check: multi-step grid with a ragged last block (no wrapper pad).
    B2 = 200
    x2 = jax.random.normal(k_x2, (B2, FEATURE_DIM), jnp.float32)
    probs2 = jax.block_until_ready(
        strategy_selector_forward(x2, *prepped, tb_max=128))
    ref2 = reference_forward(x2, *params)
    assert probs2.shape == (B2, NUM_STRATEGIES)
    assert bool(jnp.all(jnp.abs(jnp.sum(probs2, axis=-1) - 1.0) < 5e-3))
    assert bool(jnp.max(jnp.abs(probs2 - ref2)) < 2e-2)

    print("KERNEL_OK")
</pallas_src>

<mosaic_0001>
module attributes {stable_mosaic.version = 11 : i64} {
  func.func @strategy_selector_kernel(%arg0: i32, %arg1: memref<8x256xf32, #tpu.memory_space<vmem>>, %arg2: memref<256x512xbf16, #tpu.memory_space<vmem>>, %arg3: memref<1x512xf32, #tpu.memory_space<vmem>>, %arg4: memref<512x256xbf16, #tpu.memory_space<vmem>>, %arg5: memref<1x256xf32, #tpu.memory_space<vmem>>, %arg6: memref<256x128xbf16, #tpu.memory_space<vmem>>, %arg7: memref<1x128xf32, #tpu.memory_space<vmem>>, %arg8: memref<8x8xf32, #tpu.memory_space<vmem>>) attributes {dimension_semantics = [#tpu.dimension_semantics<parallel>], iteration_bounds = array<i64: 1>, scalar_prefetch = 0 : i64, scratch_operands = 0 : i64, tpu.core_type = #tpu.core_type<tc>, window_params = [{transform_indices = @transform_0, window_bounds = array<i64: 8, 256>}, {pipeline_mode = #tpu.pipeline_mode<synchronous>, transform_indices = @transform_1, window_bounds = array<i64: 256, 512>}, {pipeline_mode = #tpu.pipeline_mode<synchronous>, transform_indices = @transform_2, window_bounds = array<i64: 1, 512>}, {pipeline_mode = #tpu.pipeline_mode<synchronous>, transform_indices = @transform_3, window_bounds = array<i64: 512, 256>}, {pipeline_mode = #tpu.pipeline_mode<synchronous>, transform_indices = @transform_4, window_bounds = array<i64: 1, 256>}, {pipeline_mode = #tpu.pipeline_mode<synchronous>, transform_indices = @transform_5, window_bounds = array<i64: 256, 128>}, {pipeline_mode = #tpu.pipeline_mode<synchronous>, transform_indices = @transform_6, window_bounds = array<i64: 1, 128>}, {transform_indices = @transform_7, window_bounds = array<i64: 8, 8>}]} {
    %c0 = arith.constant 0 : index
    %c0_0 = arith.constant 0 : index
    %0 = vector.load %arg1[%c0, %c0_0] : memref<8x256xf32, #tpu.memory_space<vmem>>, vector<8x256xf32>
    %1 = arith.truncf %0 : vector<8x256xf32> to vector<8x256xbf16>
    %c0_1 = arith.constant 0 : index
    %c0_2 = arith.constant 0 : index
    %2 = vector.load %arg2[%c0_1, %c0_2] : memref<256x512xbf16, #tpu.memory_space<vmem>>, vector<256x512xbf16>
    %cst = arith.constant dense<0.000000e+00> : vector<8x512xf32>
    %3 = tpu.matmul %1, %2, %cst {dimension_numbers = #tpu.dot_dimension_numbers<[1], [0], [0], [1], [0, 0, 1, 1], [], []>} : vector<8x256xbf16>, vector<256x512xbf16>, vector<8x512xf32> -> vector<8x512xf32>
    %c0_3 = arith.constant 0 : index
    %c0_4 = arith.constant 0 : index
    %4 = vector.load %arg3[%c0_3, %c0_4] : memref<1x512xf32, #tpu.memory_space<vmem>>, vector<1x512xf32>
    %5 = vector.broadcast %4 : vector<1x512xf32> to vector<8x512xf32>
    %6 = arith.addf %3, %5 : vector<8x512xf32>
    %cst_5 = arith.constant 0.000000e+00 : f32
    %7 = vector.broadcast %cst_5 : f32 to vector<8x512xf32>
    %8 = arith.maximumf %6, %7 : vector<8x512xf32>
    %9 = arith.truncf %8 : vector<8x512xf32> to vector<8x512xbf16>
    %c0_6 = arith.constant 0 : index
    %c0_7 = arith.constant 0 : index
    %10 = vector.load %arg4[%c0_6, %c0_7] : memref<512x256xbf16, #tpu.memory_space<vmem>>, vector<512x256xbf16>
    %cst_8 = arith.constant dense<0.000000e+00> : vector<8x256xf32>
    %11 = tpu.matmul %9, %10, %cst_8 {dimension_numbers = #tpu.dot_dimension_numbers<[1], [0], [0], [1], [0, 0, 1, 1], [], []>} : vector<8x512xbf16>, vector<512x256xbf16>, vector<8x256xf32> -> vector<8x256xf32>
    %c0_9 = arith.constant 0 : index
    %c0_10 = arith.constant 0 : index
    %12 = vector.load %arg5[%c0_9, %c0_10] : memref<1x256xf32, #tpu.memory_space<vmem>>, vector<1x256xf32>
    %13 = vector.broadcast %12 : vector<1x256xf32> to vector<8x256xf32>
    %14 = arith.addf %11, %13 : vector<8x256xf32>
    %cst_11 = arith.constant 0.000000e+00 : f32
    %15 = vector.broadcast %cst_11 : f32 to vector<8x256xf32>
    %16 = arith.maximumf %14, %15 : vector<8x256xf32>
    %17 = arith.truncf %16 : vector<8x256xf32> to vector<8x256xbf16>
    %c0_12 = arith.constant 0 : index
    %c0_13 = arith.constant 0 : index
    %18 = vector.load %arg6[%c0_12, %c0_13] : memref<256x128xbf16, #tpu.memory_space<vmem>>, vector<256x128xbf16>
    %cst_14 = arith.constant dense<0.000000e+00> : vector<8x128xf32>
    %19 = tpu.matmul %17, %18, %cst_14 {dimension_numbers = #tpu.dot_dimension_numbers<[1], [0], [0], [1], [0, 0, 1, 1], [], []>} : vector<8x256xbf16>, vector<256x128xbf16>, vector<8x128xf32> -> vector<8x128xf32>
    %c0_15 = arith.constant 0 : index
    %c0_16 = arith.constant 0 : index
    %20 = vector.load %arg7[%c0_15, %c0_16] : memref<1x128xf32, #tpu.memory_space<vmem>>, vector<1x128xf32>
    %21 = vector.broadcast %20 : vector<1x128xf32> to vector<8x128xf32>
    %22 = arith.addf %19, %21 : vector<8x128xf32>
    %cst_17 = arith.constant dense<0xFF800000> : vector<8xf32>
    %23 = vector.multi_reduction <maximumf>, %22, %cst_17 [1] : vector<8x128xf32> to vector<8xf32>
    %24 = vector.shape_cast %23 : vector<8xf32> to vector<8x1xf32>
    %25 = vector.broadcast %24 : vector<8x1xf32> to vector<8x128xf32>
    %26 = arith.subf %22, %25 : vector<8x128xf32>
    %27 = math.exp %26 : vector<8x128xf32>
    %cst_18 = arith.constant dense<0.000000e+00> : vector<8xf32>
    %28 = vector.multi_reduction <add>, %27, %cst_18 [1] : vector<8x128xf32> to vector<8xf32>
    %29 = vector.shape_cast %28 : vector<8xf32> to vector<8x1xf32>
    %30 = tpu.reciprocal %29 {approx = true} : vector<8x1xf32> -> vector<8x1xf32>
    %31 = vector.broadcast %30 : vector<8x1xf32> to vector<8x128xf32>
    %32 = arith.mulf %27, %31 : vector<8x128xf32>
    %33 = vector.extract_strided_slice %32 {offsets = [0, 0], sizes = [8, 8], strides = [1, 1]} : vector<8x128xf32> to vector<8x8xf32>
    %c0_19 = arith.constant 0 : index
    %c0_20 = arith.constant 0 : index
    %34 = vector.load %arg8[%c0_19, %c0_20] : memref<8x8xf32, #tpu.memory_space<vmem>>, vector<8x8xf32>
    tpu.vector_store %arg8[%c0_19, %c0_20], %33 {strides = array<i32>} : memref<8x8xf32, #tpu.memory_space<vmem>>, vector<8x8xf32>,
    return
  }
  func.func @transform_0(%arg0: i32) -> (i32, i32) {
    %c0_i32 = arith.constant 0 : i32
    %c0_i32_0 = arith.constant 0 : i32
    return %arg0, %c0_i32 : i32, i32
  }
  func.func @transform_1(%arg0: i32) -> (i32, i32) {
    %c0_i32 = arith.constant 0 : i32
    %c0_i32_0 = arith.constant 0 : i32
    %c0_i32_1 = arith.constant 0 : i32
    return %c0_i32, %c0_i32_0 : i32, i32
  }
  func.func @transform_2(%arg0: i32) -> (i32, i32) {
    %c0_i32 = arith.constant 0 : i32
    %c0_i32_0 = arith.constant 0 : i32
    %c0_i32_1 = arith.constant 0 : i32
    return %c0_i32, %c0_i32_0 : i32, i32
  }
  func.func @transform_3(%arg0: i32) -> (i32, i32) {
    %c0_i32 = arith.constant 0 : i32
    %c0_i32_0 = arith.constant 0 : i32
    %c0_i32_1 = arith.constant 0 : i32
    return %c0_i32, %c0_i32_0 : i32, i32
  }
  func.func @transform_4(%arg0: i32) -> (i32, i32) {
    %c0_i32 = arith.constant 0 : i32
    %c0_i32_0 = arith.constant 0 : i32
    %c0_i32_1 = arith.constant 0 : i32
    return %c0_i32, %c0_i32_0 : i32, i32
  }
  func.func @transform_5(%arg0: i32) -> (i32, i32) {
    %c0_i32 = arith.constant 0 : i32
    %c0_i32_0 = arith.constant 0 : i32
    %c0_i32_1 = arith.constant 0 : i32
    return %c0_i32, %c0_i32_0 : i32, i32
  }
  func.func @transform_6(%arg0: i32) -> (i32, i32) {
    %c0_i32 = arith.constant 0 : i32
    %c0_i32_0 = arith.constant 0 : i32
    %c0_i32_1 = arith.constant 0 : i32
    return %c0_i32, %c0_i32_0 : i32, i32
  }
  func.func @transform_7(%arg0: i32) -> (i32, i32) {
    %c0_i32 = arith.constant 0 : i32
    %c0_i32_0 = arith.constant 0 : i32
    return %arg0, %c0_i32 : i32, i32
  }
}

</mosaic_0001>

<bundles_post_ra>
// kernel: tpu_custom_call.1
= control target key start
LH: loop header
LB: loop body
LE: loop exit
PB: predicated region body
PF: predicated region fallthrough
CT: control target
= control target key end

     0   :  { %12 = vsyncpa [#allocation3], 0  ;;  %s1928_s0 = inlined_call_operand.hbm [shape: f32[8,256], index: 0, kind: input, shape index: {}]   ;;  %s1929_s1 = inlined_call_operand.hbm [shape: bf16[256,512], index: 1, kind: input, shape index: {}]   ;;  %s1930_s2 = inlined_call_operand.vmem [shape: f32[1,512], index: 2, kind: input, shape index: {}]   ;;  %s1931_s3 = inlined_call_operand.hbm [shape: bf16[512,256], index: 3, kind: input, shape index: {}]   ;;  %s1932_s4 = inlined_call_operand.vmem [shape: f32[1,256], index: 4, kind: input, shape index: {}]   ;;  %s1933_s5 = inlined_call_operand.hbm [shape: bf16[256,128], index: 5, kind: input, shape index: {}]   ;;  %s1934_s6 = inlined_call_operand.vmem [shape: f32[1,128], index: 6, kind: input, shape index: {}]   ;;  %s1935_s7 = inlined_call_operand.hbm [shape: f32[8,8], index: 7, kind: output, shape index: {}]  }
   0x1   :  { %13 = vsyncpa [#allocation6], 0 }
   0x2   :  { %14 = vsyncpa [#allocation9], 0 }
   0x3   :  { %15 = vsyncpa [#allocation4], 0  ;;  %s1780_s24 = smov [#allocation5]   ;;  %s1662_s28 = scalar_lea.hbm %s1929_s1, 8192 }
   0x4   :  { %s31_s25 = sshll.u32 %s1780_s24, 4  ;;  %p1663_p0 = scmp.ne.s32.totalorder %s1929_s1, %s1662_s28  ;;  %s32_s25 = int_to_ptr.vmem [resolvable:$true] %s31_s25 }
   0x5   :  { %p1666_p1 = scmp.lt.u32.totalorder %s1662_s28, %s1929_s1 }
   0x7   :  { %p1668_p2 = pnand %p1666_p1, %p1663_p0 }
   0x9   :  { %1671 = shalt.err (!%p1668_p2)
}
   0xa   :  { %s1672_s10 = scalar_lea.vmem %s32_s25, 8192  ;;  %p1677_p4 = scmp.lt.s32.totalorder %s32_s25, %s32_s25 }
   0xb   :  { %p1673_p3 = scmp.ne.s32.totalorder %s32_s25, %s1672_s10  ;;  %p1678_p5 = scmp.lt.s32.totalorder %s1672_s10, %s1672_s10 }
   0xd   :  { %p1679_p6 = por %p1678_p5, %p1677_p4 }
   0xf   :  { %p1680_p7 = pnand %p1679_p6, %p1673_p3 }
  0x11   :  { %1683 = shalt.err (!%p1680_p7)
}
  0x12   :  { %s1781_s11 = smov 256   ;;  %s1782_s12 = smov 16  }
  0x13   :  { %37 = dma.hbm_to_vmem [thread:$0]  %s1929_s1, 8192, %s32_s25, [#allocation6], %s1781_s11, %s1781_s11, %s1782_s12  }
  0x14   :  { %s1783_s15 = smov [#allocation2]   ;;  %s1784_s17 = smov [#allocation7]  }
  0x15   :  { %s22_s16 = sshll.u32 %s1783_s15, 4  ;;  %s45_s18 = sshll.u32 %s1784_s17, 4  ;;  %s23_s16 = int_to_ptr.vmem [resolvable:$true] %s22_s16  ;;  %s46_s18 = int_to_ptr.vmem [resolvable:$true] %s45_s18 }
  0x16   :  { %s1684_s21 = scalar_lea.hbm %s1928_s0, 256 }
  0x17   :  { %p1685_p8 = scmp.ne.s32.totalorder %s1928_s0, %s1684_s21  ;;  %p1688_p9 = scmp.lt.u32.totalorder %s1684_s21, %s1928_s0 }
  0x19   :  { %p1690_p10 = pnand %p1688_p9, %p1685_p8 }
  0x1b   :  { %1693 = shalt.err (!%p1690_p10)
}
  0x1c   :  { %s1694_s1 = scalar_lea.vmem %s23_s16, 256  ;;  %p1699_p12 = scmp.lt.s32.totalorder %s23_s16, %s23_s16 }
  0x1d   :  { %p1695_p11 = scmp.ne.s32.totalorder %s23_s16, %s1694_s1  ;;  %p1700_p13 = scmp.lt.s32.totalorder %s1694_s1, %s1694_s1 }
  0x1f   :  { %p1701_p0 = por %p1700_p13, %p1699_p12 }
  0x21   :  { %p1702_p1 = pnand %p1701_p0, %p1695_p11 }
  0x23   :  { %1705 = shalt.err (!%p1702_p1)
}
  0x24   :  { %25 = dma.hbm_to_vmem [thread:$0]  %s1928_s0, 256, %s23_s16, [#allocation3]  }
  0x25   :  { %s1706_s30 = scalar_lea.hbm %s1931_s3, 8192 }
  0x26   :  { %p1707_p2 = scmp.ne.s32.totalorder %s1931_s3, %s1706_s30  ;;  %p1710_p3 = scmp.lt.u32.totalorder %s1706_s30, %s1931_s3 }
  0x28   :  { %p1712_p4 = pnand %p1710_p3, %p1707_p2 }
  0x2a   :  { %1715 = shalt.err (!%p1712_p4)
}
  0x2b   :  { %s1716_s12 = scalar_lea.vmem %s46_s18, 8192  ;;  %p1721_p6 = scmp.lt.s32.totalorder %s46_s18, %s46_s18 }
  0x2c   :  { %p1717_p5 = scmp.ne.s32.totalorder %s46_s18, %s1716_s12  ;;  %p1722_p7 = scmp.lt.s32.totalorder %s1716_s12, %s1716_s12 }
  0x2e   :  { %p1723_p8 = por %p1722_p7, %p1721_p6 }
  0x30   :  { %p1724_p9 = pnand %p1723_p8, %p1717_p5 }
  0x32   :  { %1727 = shalt.err (!%p1724_p9)
}
  0x33   :  { %s1785_s0 = smov 128   ;;  %s1786_s13 = smov 8  }
  0x34   :  { %51 = dma.hbm_to_vmem [thread:$0]  %s1931_s3, 8192, %s46_s18, [#allocation6], %s1785_s0, %s1785_s0, %s1786_s13  }
  0x35   :  { %s1787_s16 = smov [#allocation8]   ;;  %s1728_s21 = scalar_lea.hbm %s1933_s5, 2048 }
  0x36   :  { %s59_s17 = sshll.u32 %s1787_s16, 4  ;;  %p1729_p10 = scmp.ne.s32.totalorder %s1933_s5, %s1728_s21  ;;  %s60_s17 = int_to_ptr.vmem [resolvable:$true] %s59_s17 }
  0x37   :  { %p1732_p11 = scmp.lt.u32.totalorder %s1728_s21, %s1933_s5 }
  0x39   :  { %p1734_p12 = pnand %p1732_p11, %p1729_p10 }
  0x3b   :  { %1737 = shalt.err (!%p1734_p12)
}
  0x3c   :  { %s1738_s1 = scalar_lea.vmem %s60_s17, 2048  ;;  %p1743_p0 = scmp.lt.s32.totalorder %s60_s17, %s60_s17 }
  0x3d   :  { %p1739_p13 = scmp.ne.s32.totalorder %s60_s17, %s1738_s1  ;;  %p1744_p1 = scmp.lt.s32.totalorder %s1738_s1, %s1738_s1 }
  0x3f   :  { %p1745_p2 = por %p1744_p1, %p1743_p0 }
  0x41   :  { %p1746_p3 = pnand %p1745_p2, %p1739_p13 }
  0x43   :  { %1749 = shalt.err (!%p1746_p3)
}
  0x44   :  { %s1788_s3 = smov 64   ;;  %s1789_s18 = smov 4  }
  0x45   :  { %65 = dma.hbm_to_vmem [thread:$0]  %s1933_s5, 2048, %s60_s17, [#allocation9], %s1788_s3, %s1788_s3, %s1789_s18  }
  0x46   :  { %1772 = dma.done.wait [#allocation3], 256  }
  0x47   :  { %1773 = vsyncadd [#allocation3], 4294967040 }
  0x48   :  { %1774 = dma.done.wait [#allocation6], 16384  }
  0x49   :  { %1775 = vsyncadd [#allocation6], 4294950912 }
  0x4a   :  { %1776 = dma.done.wait [#allocation9], 2048  }
  0x4b   :  { %1777 = vsyncadd [#allocation9], 4294965248  ;;  %v1450_v0 = vld [vmem:[#allocation5 + $0x4] ss:$16 sps:$4 sm:$0xff]   ;;  %v1452_v1 = vld [vmem:[#allocation5] ss:$16 sps:$4 sm:$0xff]  }
  0x4c   :  { %491 = vmatprep.subr.bf16.mxu1 %v1450_v0  ;;  %v1453_v2 = vld [vmem:[#allocation5 + $0x24] ss:$16 sps:$4 sm:$0xff]   ;;  %v1455_v3 = vld [vmem:[#allocation5 + $0x20] ss:$16 sps:$4 sm:$0xff]   ;;  %v82_v13 = vld [vmem:[#allocation2 + $0x8] sm:$0xff]  ;;  %s1790_s8 = smov [#allocation10]  }
  0x4d   :  { %492 = vmatpush1.bf16.msra.mxu1 %v1452_v1  ;;  %v1456_v4 = vld [vmem:[#allocation5 + $0x44] ss:$16 sps:$4 sm:$0xff]   ;;  %v1458_v5 = vld [vmem:[#allocation5 + $0x40] ss:$16 sps:$4 sm:$0xff]   ;;  %v1879_v14 = vpack.c.bf16 %v82_v13, %v82_v13  ;;  %v1500_v45 = vld [vmem:[#allocation5 + $0xc] ss:$16 sps:$4 sm:$0xff]  }
  0x4e   :  { %493 = vmatprep.subr.bf16.mxu1 %v1453_v2  ;;  %v1459_v6 = vld [vmem:[#allocation5 + $0x64] ss:$16 sps:$4 sm:$0xff]   ;;  %v1461_v7 = vld [vmem:[#allocation5 + $0x60] ss:$16 sps:$4 sm:$0xff]   ;;  %v1498_v47 = vld [vmem:[#allocation5 + $0x8] ss:$16 sps:$4 sm:$0xff]  }
  0x4f   :  { %v1462_v8 = vld [vmem:[#allocation5 + $0x84] ss:$16 sps:$4 sm:$0xff]   ;;  %v1464_v9 = vld [vmem:[#allocation5 + $0x80] ss:$16 sps:$4 sm:$0xff]   ;;  %523 = vmatprep.mubr.bf16.mxu1 %v1879_v14  ;;  %v1503_v49 = vld [vmem:[#allocation5 + $0x2c] ss:$16 sps:$4 sm:$0xff]  }
  0x50   :  { %v1465_v10 = vld [vmem:[#allocation5 + $0xa4] ss:$16 sps:$4 sm:$0xff]   ;;  %v1467_v11 = vld [vmem:[#allocation5 + $0xa0] ss:$16 sps:$4 sm:$0xff]   ;;  %v1501_v52 = vld [vmem:[#allocation5 + $0x28] ss:$16 sps:$4 sm:$0xff]  }
  0x51   :  { %494 = vmatpush1.bf16.msra.mxu1 %v1455_v3  ;;  %v1468_v12 = vld [vmem:[#allocation5 + $0xc4] ss:$16 sps:$4 sm:$0xff]   ;;  %v1470_v15 = vld [vmem:[#allocation5 + $0xc0] ss:$16 sps:$4 sm:$0xff]   ;;  %v1506_v53 = vld [vmem:[#allocation5 + $0x4c] ss:$16 sps:$4 sm:$0xff]  }
  0x52   :  { %495 = vmatprep.subr.bf16.mxu1 %v1456_v4  ;;  %v1471_v16 = vld [vmem:[#allocation5 + $0xe4] ss:$16 sps:$4 sm:$0xff]   ;;  %v1473_v17 = vld [vmem:[#allocation5 + $0xe0] ss:$16 sps:$4 sm:$0xff]   ;;  %v1504_v56 = vld [vmem:[#allocation5 + $0x48] ss:$16 sps:$4 sm:$0xff]  }
  0x53   :  { %v1474_v18 = vld [vmem:[#allocation5 + $0x104] ss:$16 sps:$4 sm:$0xff]   ;;  %v1476_v19 = vld [vmem:[#allocation5 + $0x100] ss:$16 sps:$4 sm:$0xff]   ;;  %v1509_v57 = vld [vmem:[#allocation5 + $0x6c] ss:$16 sps:$4 sm:$0xff]  }
  0x54   :  { %v1477_v20 = vld [vmem:[#allocation5 + $0x124] ss:$16 sps:$4 sm:$0xff]   ;;  %v1479_v21 = vld [vmem:[#allocation5 + $0x120] ss:$16 sps:$4 sm:$0xff]   ;;  %v1507_v60 = vld [vmem:[#allocation5 + $0x68] ss:$16 sps:$4 sm:$0xff]  }
  0x55   :  { %496 = vmatpush1.bf16.msra.mxu1 %v1458_v5  ;;  %v1480_v22 = vld [vmem:[#allocation5 + $0x144] ss:$16 sps:$4 sm:$0xff]   ;;  %v1482_v23 = vld [vmem:[#allocation5 + $0x140] ss:$16 sps:$4 sm:$0xff]   ;;  %v1512_v61 = vld [vmem:[#allocation5 + $0x8c] ss:$16 sps:$4 sm:$0xff]  }
  0x56   :  { %497 = vmatprep.subr.bf16.mxu1 %v1459_v6  ;;  %v1483_v24 = vld [vmem:[#allocation5 + $0x164] ss:$16 sps:$4 sm:$0xff]   ;;  %v1485_v25 = vld [vmem:[#allocation5 + $0x160] ss:$16 sps:$4 sm:$0xff]   ;;  %v1510_v0 = vld [vmem:[#allocation5 + $0x88] ss:$16 sps:$4 sm:$0xff]  }
  0x57   :  { %v1486_v26 = vld [vmem:[#allocation5 + $0x184] ss:$16 sps:$4 sm:$0xff]   ;;  %v1548_v28 = vld [vmem:[#allocation7] ss:$8 sps:$4 sm:$0xff]   ;;  %v1551_v31 = vld [vmem:[#allocation7 + $0x10] ss:$8 sps:$4 sm:$0xff]  }
  0x58   :  { %v1546_v27 = vld [vmem:[#allocation7 + $0x4] ss:$8 sps:$4 sm:$0xff]   ;;  %v1549_v29 = vld [vmem:[#allocation7 + $0x14] ss:$8 sps:$4 sm:$0xff]   ;;  %v1488_v30 = vld [vmem:[#allocation5 + $0x180] ss:$16 sps:$4 sm:$0xff]  }
  0x59   :  { %498 = vmatpush1.bf16.msra.mxu1 %v1461_v7  ;;  %977 = vmatprep.subr.bf16.mxu0 %v1546_v27  ;;  %v1489_v32 = vld [vmem:[#allocation5 + $0x1a4] ss:$16 sps:$4 sm:$0xff]   ;;  %v1491_v34 = vld [vmem:[#allocation5 + $0x1a0] ss:$16 sps:$4 sm:$0xff]   ;;  %v1515_v1 = vld [vmem:[#allocation5 + $0xac] ss:$16 sps:$4 sm:$0xff]  }
  0x5a   :  { %499 = vmatprep.subr.bf16.mxu1 %v1462_v8  ;;  %978 = vmatpush1.bf16.msra.mxu0 %v1548_v28  ;;  %v1552_v33 = vld [vmem:[#allocation7 + $0x24] ss:$8 sps:$4 sm:$0xff]   ;;  %v1554_v35 = vld [vmem:[#allocation7 + $0x20] ss:$8 sps:$4 sm:$0xff]   ;;  %v1555_v37 = vld [vmem:[#allocation7 + $0x34] ss:$8 sps:$4 sm:$0xff]  }
  0x5b   :  { %979 = vmatprep.subr.bf16.mxu0 %v1549_v29  ;;  %v1492_v36 = vld [vmem:[#allocation5 + $0x1c4] ss:$16 sps:$4 sm:$0xff]   ;;  %v1494_v38 = vld [vmem:[#allocation5 + $0x1c0] ss:$16 sps:$4 sm:$0xff]   ;;  %v1513_v4 = vld [vmem:[#allocation5 + $0xa8] ss:$16 sps:$4 sm:$0xff]  }
  0x5c   :  { %v1557_v39 = vld [vmem:[#allocation7 + $0x30] ss:$8 sps:$4 sm:$0xff]   ;;  %v1495_v40 = vld [vmem:[#allocation5 + $0x1e4] ss:$16 sps:$4 sm:$0xff]   ;;  %v1560_v44 = vld [vmem:[#allocation7 + $0x40] ss:$8 sps:$4 sm:$0xff]  }
  0x5d   :  { %500 = vmatpush1.bf16.msra.mxu1 %v1464_v9  ;;  %v1558_v41 = vld [vmem:[#allocation7 + $0x44] ss:$8 sps:$4 sm:$0xff]   ;;  %v1497_v42 = vld [vmem:[#allocation5 + $0x1e0] ss:$16 sps:$4 sm:$0xff]   ;;  %v1561_v46 = vld [vmem:[#allocation7 + $0x54] ss:$8 sps:$4 sm:$0xff]  }
  0x5e   :  { %501 = vmatprep.subr.bf16.mxu1 %v1465_v10  ;;  %980 = vmatpush1.bf16.msra.mxu0 %v1551_v31  ;;  %v81_v43 = vld [vmem:[#allocation2] sm:$0xff]  ;;  %v1564_v51 = vld [vmem:[#allocation7 + $0x64] ss:$8 sps:$4 sm:$0xff]   ;;  %v1566_v54 = vld [vmem:[#allocation7 + $0x60] ss:$8 sps:$4 sm:$0xff]   ;;  %s1255_s9 = sshll.u32 %s1790_s8, 4  ;;  %s1256_s9 = int_to_ptr.vmem [resolvable:$true] %s1255_s9 }
  0x5f   :  { %981 = vmatprep.subr.bf16.mxu0 %v1552_v33  ;;  %v1882_v48 = vpack.c.bf16 %v81_v43, %v81_v43  ;;  %v1563_v50 = vld [vmem:[#allocation7 + $0x50] ss:$8 sps:$4 sm:$0xff]   ;;  %v1567_v55 = vld [vmem:[#allocation7 + $0x74] ss:$8 sps:$4 sm:$0xff]   ;;  %v1570_v59 = vld [vmem:[#allocation7 + $0x84] ss:$8 sps:$4 sm:$0xff]   ;;  %p1755_p5 = scmp.lt.s32.totalorder %s1256_s9, %s1256_s9 }
  0x60   :  { %v1569_v58 = vld [vmem:[#allocation7 + $0x70] ss:$8 sps:$4 sm:$0xff]   ;;  %v1572_v62 = vld [vmem:[#allocation7 + $0x80] ss:$8 sps:$4 sm:$0xff]   ;;  %v1573_v63 = vld [vmem:[#allocation7 + $0x94] ss:$8 sps:$4 sm:$0xff]  }
  0x61   :  { %502 = vmatpush1.bf16.msra.mxu1 %v1467_v11  ;;  %v1575_v2 = vld [vmem:[#allocation7 + $0x90] ss:$8 sps:$4 sm:$0xff]   ;;  %v1576_v3 = vld [vmem:[#allocation7 + $0xa4] ss:$8 sps:$4 sm:$0xff]   ;;  %v1578_v6 = vld [vmem:[#allocation7 + $0xa0] ss:$8 sps:$4 sm:$0xff]  }
  0x62   :  { %503 = vmatprep.subr.bf16.mxu1 %v1468_v12  ;;  %982 = vmatpush1.bf16.msra.mxu0 %v1554_v35  ;;  %v1518_v5 = vld [vmem:[#allocation5 + $0xcc] ss:$16 sps:$4 sm:$0xff]   ;;  %v1516_v8 = vld [vmem:[#allocation5 + $0xc8] ss:$16 sps:$4 sm:$0xff]   ;;  %vm1247_vm0 = vcmask 64512  }
  0x63   :  { %983 = vmatprep.subr.bf16.mxu0 %v1555_v37  ;;  %v1579_v7 = vld [vmem:[#allocation7 + $0xb4] ss:$8 sps:$4 sm:$0xff]   ;;  %v1581_v10 = vld [vmem:[#allocation7 + $0xb0] ss:$8 sps:$4 sm:$0xff]   ;;  %v1582_v11 = vld [vmem:[#allocation7 + $0xc4] ss:$8 sps:$4 sm:$0xff]  }
  0x64   :  { %v1521_v9 = vld [vmem:[#allocation5 + $0xec] ss:$16 sps:$4 sm:$0xff]   ;;  %v1519_v12 = vld [vmem:[#allocation5 + $0xe8] ss:$16 sps:$4 sm:$0xff]   ;;  %v1642_v37 = vld [vmem:[#allocation8 + $0x40] sm:$0xff]  }
  0x65   :  { %504 = vmatpush1.bf16.msra.mxu1 %v1470_v15  ;;  %v1524_v13 = vld [vmem:[#allocation5 + $0x10c] ss:$16 sps:$4 sm:$0xff]   ;;  %v1537_v27 = vld [vmem:[#allocation5 + $0x1a8] ss:$16 sps:$4 sm:$0xff]  }
  0x66   :  { %505 = vmatprep.subr.bf16.mxu1 %v1471_v16  ;;  %984 = vmatpush1.bf16.msra.mxu0 %v1557_v39  ;;  %v1585_v15 = vld [vmem:[#allocation7 + $0xd4] ss:$8 sps:$4 sm:$0xff]   ;;  %v1522_v16 = vld [vmem:[#allocation5 + $0x108] ss:$16 sps:$4 sm:$0xff]  }
  0x67   :  { %985 = vmatprep.subr.bf16.mxu0 %v1558_v41  ;;  %v1542_v28 = vld [vmem:[#allocation5 + $0x1cc] ss:$16 sps:$4 sm:$0xff]   ;;  %v1540_v29 = vld [vmem:[#allocation5 + $0x1c8] ss:$16 sps:$4 sm:$0xff]   ;;  %v1646_v41 = vld [vmem:[#allocation8 + $0x50] sm:$0xff]  }
  0x68   :  { %v1543_v31 = vld [vmem:[#allocation5 + $0x1e8] ss:$16 sps:$4 sm:$0xff]  }
  0x69   :  { %506 = vmatpush1.bf16.msra.mxu1 %v1473_v17  ;;  %v1527_v17 = vld [vmem:[#allocation5 + $0x12c] ss:$16 sps:$4 sm:$0xff]   ;;  %v1590_v33 = vld [vmem:[#allocation7 + $0xe0] ss:$8 sps:$4 sm:$0xff]   ;;  %v1593_v35 = vld [vmem:[#allocation7 + $0xf0] ss:$8 sps:$4 sm:$0xff]  }
  0x6a   :  { %507 = vmatprep.subr.bf16.mxu1 %v1474_v18  ;;  %986 = vmatpush1.bf16.msra.mxu0 %v1560_v44  ;;  %v1587_v18 = vld [vmem:[#allocation7 + $0xd0] ss:$8 sps:$4 sm:$0xff]   ;;  %v1644_v39 = vld [vmem:[#allocation8 + $0x48] sm:$0xff]  }
  0x6b   :  { %987 = vmatprep.subr.bf16.mxu0 %v1561_v46  ;;  %v1648_v43 = vld [vmem:[#allocation8 + $0x58] sm:$0xff]   ;;  %v1651_v46 = vld [vmem:[#allocation8 + $0x20] sm:$0xff]  }
  0x6c   :  { %v1649_v44 = vld [vmem:[#allocation8 + $0x18] sm:$0xff]  }
  0x6d   :  { %508 = vmatpush1.bf16.msra.mxu1 %v1476_v19  ;;  %v1525_v19 = vld [vmem:[#allocation5 + $0x128] ss:$16 sps:$4 sm:$0xff]  }
  0x6e   :  { %509 = vmatprep.subr.bf16.mxu1 %v1477_v20  ;;  %988 = vmatpush1.bf16.msra.mxu0 %v1563_v50  ;;  %v1530_v20 = vld [vmem:[#allocation5 + $0x14c] ss:$16 sps:$4 sm:$0xff]  }
  0x6f   :  { %989 = vmatprep.subr.bf16.mxu0 %v1564_v51 }
  0x71   :  { %510 = vmatpush1.bf16.msra.mxu1 %v1479_v21  ;;  %v1528_v21 = vld [vmem:[#allocation5 + $0x148] ss:$16 sps:$4 sm:$0xff]  }
  0x72   :  { %511 = vmatprep.subr.bf16.mxu1 %v1480_v22  ;;  %990 = vmatpush1.bf16.msra.mxu0 %v1566_v54  ;;  %v1533_v22 = vld [vmem:[#allocation5 + $0x16c] ss:$16 sps:$4 sm:$0xff]  }
  0x73   :  { %991 = vmatprep.subr.bf16.mxu0 %v1567_v55 }
  0x75   :  { %512 = vmatpush1.bf16.msra.mxu1 %v1482_v23  ;;  %v1531_v23 = vld [vmem:[#allocation5 + $0x168] ss:$16 sps:$4 sm:$0xff]  }
  0x76   :  { %513 = vmatprep.subr.bf16.mxu1 %v1483_v24  ;;  %992 = vmatpush1.bf16.msra.mxu0 %v1569_v58  ;;  %v1536_v24 = vld [vmem:[#allocation5 + $0x18c] ss:$16 sps:$4 sm:$0xff]  }
  0x77   :  { %993 = vmatprep.subr.bf16.mxu0 %v1570_v59 }
  0x79   :  { %514 = vmatpush1.bf16.msra.mxu1 %v1485_v25  ;;  %v1534_v25 = vld [vmem:[#allocation5 + $0x188] ss:$16 sps:$4 sm:$0xff]  }
  0x7a   :  { %515 = vmatprep.subr.bf16.mxu1 %v1486_v26  ;;  %994 = vmatpush1.bf16.msra.mxu0 %v1572_v62  ;;  %v1539_v26 = vld [vmem:[#allocation5 + $0x1ac] ss:$16 sps:$4 sm:$0xff]  }
  0x7b   :  { %995 = vmatprep.subr.bf16.mxu0 %v1573_v63 }
  0x7d   :  { %516 = vmatpush1.bf16.msra.mxu1 %v1488_v30  ;;  %v1545_v30 = vld [vmem:[#allocation5 + $0x1ec] ss:$16 sps:$4 sm:$0xff]  }
  0x7e   :  { %517 = vmatprep.subr.bf16.mxu1 %v1489_v32  ;;  %996 = vmatpush1.bf16.msra.mxu0 %v1575_v2  ;;  %v1588_v32 = vld [vmem:[#allocation7 + $0xe4] ss:$8 sps:$4 sm:$0xff]   ;;  %v1594_v2 = vld [vmem:[#allocation7 + $0x100] ss:$8 sps:$4 sm:$0xff]  }
  0x7f   :  { %997 = vmatprep.subr.bf16.mxu0 %v1576_v3  ;;  %v1599_v3 = vld [vmem:[#allocation7 + $0x114] ss:$8 sps:$4 sm:$0xff]  }
  0x81   :  { %518 = vmatpush1.bf16.msra.mxu1 %v1491_v34  ;;  %v1591_v34 = vld [vmem:[#allocation7 + $0xf4] ss:$8 sps:$4 sm:$0xff]  }
  0x82   :  { %519 = vmatprep.subr.bf16.mxu1 %v1492_v36  ;;  %998 = vmatpush1.bf16.msra.mxu0 %v1578_v6  ;;  %v1596_v36 = vld [vmem:[#allocation7 + $0x104] ss:$8 sps:$4 sm:$0xff]   ;;  %v1600_v6 = vld [vmem:[#allocation7 + $0x120] ss:$8 sps:$4 sm:$0xff]  }
  0x83   :  { %999 = vmatprep.subr.bf16.mxu0 %v1579_v7  ;;  %v1605_v7 = vld [vmem:[#allocation7 + $0x134] ss:$8 sps:$4 sm:$0xff]  }
  0x85   :  { %520 = vmatpush1.bf16.msra.mxu1 %v1494_v38  ;;  %v1643_v38 = vld [vmem:[#allocation8] sm:$0xff]  }
  0x86   :  { %521 = vmatprep.subr.bf16.mxu1 %v1495_v40  ;;  %1000 = vmatpush1.bf16.msra.mxu0 %v1581_v10  ;;  %v1645_v40 = vld [vmem:[#allocation8 + $0x8] sm:$0xff]  }
  0x87   :  { %1001 = vmatprep.subr.bf16.mxu0 %v1582_v11  ;;  %v1606_v10 = vld [vmem:[#allocation7 + $0x140] ss:$8 sps:$4 sm:$0xff]   ;;  %v1611_v11 = vld [vmem:[#allocation7 + $0x154] ss:$8 sps:$4 sm:$0xff]  }
  0x89   :  { %522 = vmatpush1.bf16.msra.mxu1 %v1497_v42  ;;  %v1647_v42 = vld [vmem:[#allocation8 + $0x10] sm:$0xff]  }
  0x8a   :  { %532 = vmatprep.subr.bf16.mxu1 %v1500_v45  ;;  %v1650_v45 = vld [vmem:[#allocation8 + $0x60] sm:$0xff]  }
  0x8c   :  { %524 = vmatmul.mubr.bf16.vlgmr.msra.gmra.mrb[0].mxu1 %v1882_v48 }
  0x8d   :  { %533 = vmatpush1.bf16.msra.mxu1 %v1498_v47  ;;  %564 = vmatprep.mubr.bf16.mxu1 %v1879_v14  ;;  %v1584_v14 = vld [vmem:[#allocation7 + $0xc0] ss:$8 sps:$4 sm:$0xff]  }
  0x8e   :  { %534 = vmatprep.subr.bf16.mxu1 %v1503_v49  ;;  %1002 = vmatpush1.bf16.msra.mxu0 %v1584_v14  ;;  %v1652_v47 = vld [vmem:[#allocation8 + $0x68] sm:$0xff]   ;;  %v151_v49 = vlaneseq }
  0x8f   :  { %1003 = vmatprep.subr.bf16.mxu0 %v1585_v15  ;;  %v1612_v14 = vld [vmem:[#allocation7 + $0x160] ss:$8 sps:$4 sm:$0xff]   ;;  %v1617_v15 = vld [vmem:[#allocation7 + $0x174] ss:$8 sps:$4 sm:$0xff]  }
  0x90   :  { %v1887_v50 = vshrl.u32 %v151_v49, 7  ;;  %v1656_v49 = vld [vmem:[#allocation8 + $0x78] sm:$0xff]  }
  0x91   :  { %535 = vmatpush1.bf16.msra.mxu1 %v1501_v52  ;;  %v1893_v52 = vld [vmem:[%s1930_s2] sm:$0xf] }
  0x92   :  { %536 = vmatprep.subr.bf16.mxu1 %v1506_v53  ;;  %1004 = vmatpush1.bf16.msra.mxu0 %v1587_v18  ;;  %v153_v51 = vsub.s32 0, %v1887_v50  ;;  %v157_v53 = vsub.s32 1, %v1887_v50  ;;  %v1618_v18 = vld [vmem:[#allocation7 + $0x180] ss:$8 sps:$4 sm:$0xff]  }
  0x93   :  { %1005 = vmatprep.subr.bf16.mxu0 %v1588_v32 }
  0x94   :  { %v154_v54 = vrot.slane %v1893_v52, %v153_v51  ;;  %v158_v55 = vrot.slane %v1893_v52, %v157_v53 }
  0x95   :  { %537 = vmatpush1.bf16.msra.mxu1 %v1504_v56 }
  0x96   :  { %538 = vmatprep.subr.bf16.mxu1 %v1509_v57  ;;  %1006 = vmatpush1.bf16.msra.mxu0 %v1590_v33 }
  0x97   :  { %1007 = vmatprep.subr.bf16.mxu0 %v1591_v34  ;;  %v1636_v34 = vld [vmem:[#allocation7 + $0x1e0] ss:$8 sps:$4 sm:$0xff]  }
  0x99   :  { %539 = vmatpush1.bf16.msra.mxu1 %v1507_v60 }
  0x9a   :  { %540 = vmatprep.subr.bf16.mxu1 %v1512_v61  ;;  %1008 = vmatpush1.bf16.msra.mxu0 %v1593_v35  ;;  %v1641_v35 = vld [vmem:[#allocation7 + $0x1f4] ss:$8 sps:$4 sm:$0xff]  }
  0x9b   :  { %1018 = vmatprep.subr.bf16.mxu0 %v1596_v36 }
  0x9d   :  { %541 = vmatpush1.bf16.msra.mxu1 %v1510_v0 }
  0x9e   :  { %542 = vmatprep.subr.bf16.mxu1 %v1515_v1 }
  0xa1   :  { %543 = vmatpush1.bf16.msra.mxu1 %v1513_v4  ;;  %v1597_v4 = vld [vmem:[#allocation7 + $0x110] ss:$8 sps:$4 sm:$0xff]  }
  0xa2   :  { %544 = vmatprep.subr.bf16.mxu1 %v1518_v5  ;;  %v1602_v5 = vld [vmem:[#allocation7 + $0x124] ss:$8 sps:$4 sm:$0xff]  }
  0xa5   :  { %545 = vmatpush1.bf16.msra.mxu1 %v1516_v8  ;;  %v1603_v8 = vld [vmem:[#allocation7 + $0x130] ss:$8 sps:$4 sm:$0xff]  }
  0xa6   :  { %546 = vmatprep.subr.bf16.mxu1 %v1521_v9  ;;  %v1608_v9 = vld [vmem:[#allocation7 + $0x144] ss:$8 sps:$4 sm:$0xff]  }
  0xa9   :  { %547 = vmatpush1.bf16.msra.mxu1 %v1519_v12  ;;  %v1609_v12 = vld [vmem:[#allocation7 + $0x150] ss:$8 sps:$4 sm:$0xff]  }
  0xaa   :  { %548 = vmatprep.subr.bf16.mxu1 %v1524_v13  ;;  %v1614_v13 = vld [vmem:[#allocation7 + $0x164] ss:$8 sps:$4 sm:$0xff]  }
  0xad   :  { %549 = vmatpush1.bf16.msra.mxu1 %v1522_v16  ;;  %v1615_v16 = vld [vmem:[#allocation7 + $0x170] ss:$8 sps:$4 sm:$0xff]  }
  0xae   :  { %550 = vmatprep.subr.bf16.mxu1 %v1527_v17  ;;  %v1620_v17 = vld [vmem:[#allocation7 + $0x184] ss:$8 sps:$4 sm:$0xff]  }
  0xb1   :  { %551 = vmatpush1.bf16.msra.mxu1 %v1525_v19  ;;  %v1623_v19 = vld [vmem:[#allocation7 + $0x194] ss:$8 sps:$4 sm:$0xff]  }
  0xb2   :  { %552 = vmatprep.subr.bf16.mxu1 %v1530_v20  ;;  %v1621_v20 = vld [vmem:[#allocation7 + $0x190] ss:$8 sps:$4 sm:$0xff]  }
  0xb5   :  { %553 = vmatpush1.bf16.msra.mxu1 %v1528_v21  ;;  %v1626_v21 = vld [vmem:[#allocation7 + $0x1a4] ss:$8 sps:$4 sm:$0xff]  }
  0xb6   :  { %554 = vmatprep.subr.bf16.mxu1 %v1533_v22  ;;  %v1624_v22 = vld [vmem:[#allocation7 + $0x1a0] ss:$8 sps:$4 sm:$0xff]  }
  0xb9   :  { %555 = vmatpush1.bf16.msra.mxu1 %v1531_v23  ;;  %v1629_v23 = vld [vmem:[#allocation7 + $0x1b4] ss:$8 sps:$4 sm:$0xff]  }
  0xba   :  { %556 = vmatprep.subr.bf16.mxu1 %v1536_v24  ;;  %v1627_v24 = vld [vmem:[#allocation7 + $0x1b0] ss:$8 sps:$4 sm:$0xff]  }
  0xbd   :  { %557 = vmatpush1.bf16.msra.mxu1 %v1534_v25  ;;  %v1632_v25 = vld [vmem:[#allocation7 + $0x1c4] ss:$8 sps:$4 sm:$0xff]  }
  0xbe   :  { %558 = vmatprep.subr.bf16.mxu1 %v1539_v26  ;;  %v1630_v26 = vld [vmem:[#allocation7 + $0x1c0] ss:$8 sps:$4 sm:$0xff]  }
  0xc1   :  { %559 = vmatpush1.bf16.msra.mxu1 %v1537_v27  ;;  %v1635_v27 = vld [vmem:[#allocation7 + $0x1d4] ss:$8 sps:$4 sm:$0xff]  }
  0xc2   :  { %560 = vmatprep.subr.bf16.mxu1 %v1542_v28  ;;  %v161_v28 = vsub.s32 2, %v1887_v50 }
  0xc4   :  { %v162_v32 = vrot.slane %v1893_v52, %v161_v28 }
  0xc5   :  { %561 = vmatpush1.bf16.msra.mxu1 %v1540_v29  ;;  %v1633_v29 = vld [vmem:[#allocation7 + $0x1d0] ss:$8 sps:$4 sm:$0xff]  }
  0xc6   :  { %562 = vmatprep.subr.bf16.mxu1 %v1545_v30  ;;  %v165_v30 = vsub.s32 3, %v1887_v50 }
  0xc8   :  { %v166_v33 = vrot.slane %v1893_v52, %v165_v30  ;;  %v1657_v52 = vld [vmem:[#allocation8 + $0x38] sm:$0xff]  }
  0xc9   :  { %563 = vmatpush1.bf16.msra.mxu1 %v1543_v31  ;;  %v1638_v31 = vld [vmem:[#allocation7 + $0x1e4] ss:$8 sps:$4 sm:$0xff]  }
  0xca   :  { %1411 = vmatprep.subr.bf16.mxu1 %v1642_v37 }
  0xcc   :  { %565 = vmatmul.mubr.bf16.vlgmr.msra.gmra.mrb[4].mxu1 %v1882_v48  ;;  %v1653_v48 = vld [vmem:[#allocation8 + $0x28] sm:$0xff]  }
  0xcd   :  { %1412 = vmatpush3.bf16.msra.mxu1 %v1643_v38 }
  0xce   :  { %1413 = vmatprep.subr.bf16.mxu1 %v1644_v39 }
  0xd1   :  { %1414 = vmatpush3.bf16.msra.mxu1 %v1645_v40 }
  0xd2   :  { %1415 = vmatprep.subr.bf16.mxu1 %v1646_v41  ;;  %v1639_v41 = vld [vmem:[#allocation7 + $0x1f0] ss:$8 sps:$4 sm:$0xff]  }
  0xd5   :  { %1416 = vmatpush3.bf16.msra.mxu1 %v1647_v42 }
  0xd6   :  { %1417 = vmatprep.subr.bf16.mxu1 %v1648_v43 }
  0xd9   :  { %1418 = vmatpush3.bf16.msra.mxu1 %v1649_v44 }
  0xda   :  { %1419 = vmatprep.subr.bf16.mxu1 %v1650_v45 }
  0xdd   :  { %1420 = vmatpush3.bf16.msra.mxu1 %v1651_v46 }
  0xde   :  { %1421 = vmatprep.subr.bf16.mxu1 %v1652_v47  ;;  %v1654_v47 = vld [vmem:[#allocation8 + $0x70] sm:$0xff]  }
  0xe1   :  { %1422 = vmatpush3.bf16.msra.mxu1 %v1653_v48  ;;  %v1655_v48 = vld [vmem:[#allocation8 + $0x30] sm:$0xff]  }
  0xe2   :  { %1423 = vmatprep.subr.bf16.mxu1 %v1654_v47 }
  0xe5   :  { %1424 = vmatpush3.bf16.msra.mxu1 %v1655_v48 }
  0xe6   :  { %1425 = vmatprep.subr.bf16.mxu1 %v1656_v49 }
  0xe9   :  { %1426 = vmatpush3.bf16.msra.mxu1 %v1657_v52 }
 0x15f   :  { %v525_v56 = vpop.f32.mrb[0].mxu1 }
 0x160   :  { %v526_v57 = vadd.f32 %v525_v56, %v154_v54  ;;  %v527_v58 = vpop.f32.mrb[1].mxu1  ;;  %v645_v54 = vld [vmem:[%s1932_s4] sm:$0x3] }
 0x161   :  { %v528_v59 = vadd.f32 %v527_v58, %v158_v55  ;;  %v529_v60 = vpop.f32.mrb[2].mxu1  ;;  %v650_v55 = vrot.slane %v645_v54, %v153_v51  ;;  %v654_v56 = vrot.slane %v645_v54, %v157_v53  ;;  %v1394_v51 = vld [vmem:[%s1934_s6] ss:$0 sm:$0xff]  ;;  %s1750_s6 = scalar_lea.vmem %s1256_s9, 128 }
 0x162   :  { %v573_v61 = vmax.f32 %v526_v57, 0.0  ;;  %v530_v62 = vpop.f32.mrb[3].mxu1  ;;  %p1751_p4 = scmp.ne.s32.totalorder %s1256_s9, %s1750_s6  ;;  %p1756_p6 = scmp.lt.s32.totalorder %s1750_s6, %s1750_s6 }
 0x163   :  { %v574_v63 = vmax.f32 %v528_v59, 0.0 }
 0x164   :  { %v577_v0 = vpack.c.bf16 %v573_v61, %v573_v61  ;;  %p1757_p7 = por %p1756_p6, %p1755_p5 }
 0x165   :  { %v578_v1 = vpack.c.bf16 %v574_v63, %v574_v63 }
 0x166   :  { %p1758_p8 = pnand %p1757_p7, %p1751_p4 }
 0x167   :  { %1009 = vmatprep.mubr.bf16.mxu0 %v578_v1 }
 0x168   :  { %1010 = vmatmul.mubr.bf16.vlgmr.msra.gmra.mrb[0].mxu0 %v577_v0 }
 0x169   :  { %1019 = vmatpush1.bf16.msra.mxu0 %v1594_v2 }
 0x16a   :  { %1020 = vmatprep.subr.bf16.mxu0 %v1599_v3 }
 0x16d   :  { %1021 = vmatpush1.bf16.msra.mxu0 %v1597_v4 }
 0x16e   :  { %1022 = vmatprep.subr.bf16.mxu0 %v1602_v5 }
 0x171   :  { %1023 = vmatpush1.bf16.msra.mxu0 %v1600_v6 }
 0x172   :  { %1024 = vmatprep.subr.bf16.mxu0 %v1605_v7 }
 0x175   :  { %1025 = vmatpush1.bf16.msra.mxu0 %v1603_v8 }
 0x176   :  { %1026 = vmatprep.subr.bf16.mxu0 %v1608_v9 }
 0x179   :  { %1027 = vmatpush1.bf16.msra.mxu0 %v1606_v10 }
 0x17a   :  { %1028 = vmatprep.subr.bf16.mxu0 %v1611_v11 }
 0x17d   :  { %1029 = vmatpush1.bf16.msra.mxu0 %v1609_v12 }
 0x17e   :  { %1030 = vmatprep.subr.bf16.mxu0 %v1614_v13 }
 0x181   :  { %1031 = vmatpush1.bf16.msra.mxu0 %v1612_v14 }
 0x182   :  { %1032 = vmatprep.subr.bf16.mxu0 %v1617_v15 }
 0x185   :  { %1033 = vmatpush1.bf16.msra.mxu0 %v1615_v16 }
 0x186   :  { %1034 = vmatprep.subr.bf16.mxu0 %v1620_v17 }
 0x189   :  { %1035 = vmatpush1.bf16.msra.mxu0 %v1618_v18 }
 0x18a   :  { %1036 = vmatprep.subr.bf16.mxu0 %v1623_v19 }
 0x18d   :  { %1037 = vmatpush1.bf16.msra.mxu0 %v1621_v20 }
 0x18e   :  { %1038 = vmatprep.subr.bf16.mxu0 %v1626_v21 }
 0x191   :  { %1039 = vmatpush1.bf16.msra.mxu0 %v1624_v22 }
 0x192   :  { %1040 = vmatprep.subr.bf16.mxu0 %v1629_v23 }
 0x195   :  { %1041 = vmatpush1.bf16.msra.mxu0 %v1627_v24 }
 0x196   :  { %1042 = vmatprep.subr.bf16.mxu0 %v1632_v25 }
 0x199   :  { %1043 = vmatpush1.bf16.msra.mxu0 %v1630_v26 }
 0x19a   :  { %1044 = vmatprep.subr.bf16.mxu0 %v1635_v27 }
 0x19d   :  { %1045 = vmatpush1.bf16.msra.mxu0 %v1633_v29 }
 0x19e   :  { %1046 = vmatprep.subr.bf16.mxu0 %v1638_v31 }
 0x19f   :  { %v566_v36 = vpop.f32.mrb[4].mxu1 }
 0x1a0   :  { %v567_v37 = vadd.f32 %v566_v36, %v162_v32  ;;  %v568_v38 = vpop.f32.mrb[5].mxu1 }
 0x1a1   :  { %v569_v39 = vadd.f32 %v568_v38, %v166_v33  ;;  %v570_v40 = vpop.f32.mrb[6].mxu1  ;;  %1047 = vmatpush1.bf16.msra.mxu0 %v1636_v34 }
 0x1a2   :  { %v575_v42 = vmax.f32 %v567_v37, 0.0  ;;  %v571_v43 = vpop.f32.mrb[7].mxu1  ;;  %1048 = vmatprep.subr.bf16.mxu0 %v1641_v35 }
 0x1a3   :  { %v576_v44 = vmax.f32 %v569_v39, 0.0 }
 0x1a4   :  { %v579_v46 = vpack.c.bf16 %v575_v42, %v575_v42 }
 0x1a5   :  { %v580_v45 = vpack.c.bf16 %v576_v44, %v576_v44  ;;  %1049 = vmatpush1.bf16.msra.mxu0 %v1639_v41 }
 0x1a7   :  { %1050 = vmatprep.mubr.bf16.mxu0 %v580_v45 }
 0x1a8   :  { %1051 = vmatmul.mubr.bf16.vlgmr.msra.gmra.mrb[0].mxu0 %v579_v46 }
 0x27b   :  { %v1052_v57 = vpop.f32.mrb[0].mxu0 }
 0x27c   :  { %v1433_v58 = vadd.f32 %v1052_v57, %v650_v55  ;;  %v1054_v59 = vpop.f32.mrb[1].mxu0 }
 0x27d   :  { %v1434_v60 = vadd.f32 %v1054_v59, %v654_v56  ;;  %v1056_v61 = vpop.f32.mrb[2].mxu0 }
 0x27e   :  { %v1059_v62 = vmax.f32 %v1433_v58, 0.0  ;;  %v1057_v63 = vpop.f32.mrb[3].mxu0 }
 0x27f   :  { %v1060_v0 = vmax.f32 %v1434_v60, 0.0 }
 0x280   :  { %v1061_v2 = vpack.c.bf16 %v1059_v62, %v1059_v62 }
 0x281   :  { %v1062_v1 = vpack.c.bf16 %v1060_v0, %v1060_v0 }
 0x283   :  { %1230 = vmatprep.mubr.bf16.mxu1 %v1062_v1 }
 0x284   :  { %1231 = vmatmul.mubr.bf16.vlgmr.msra.gmra.mrb[8].mxu1 %v1061_v2 }
 0x357   :  { %v1427_v3 = vpop.f32.mrb[8].mxu1 }
 0x358   :  { %v1428_v4 = vpop.f32.mrb[9].mxu1 }
 0x359   :  { %v1429_v50 = vadd.f32 %v1428_v4, %v1427_v3  ;;  %v1430_v53 = vpop.f32.mrb[10].mxu1 }
 0x35a   :  { %v1431_v5 = vpop.f32.mrb[11].mxu1 }
 0x35b   :  { %v1233_v6 = vadd.f32 %v1429_v50, %v1394_v51 }
 0x35d   :  { %1238 = vmax.xlane.f32.xlu0 %v1233_v6 }
 0x3ea   :  { %v1239_v7 = vpop.xlane.xlu0 %1238 }
 0x3eb   :  { %v1240_v8 = vsub.f32 %v1233_v6, %v1239_v7 }
 0x3ed   :  { %v1241_v9 = vmul.f32 1.442695, %v1240_v8 }
 0x3ef   :  { %1658 = vpow2.f32 %v1241_v9 }
 0x3f9   :  { %v1659_v10 = vpop.eup %1658 }
 0x3fa   :  { %1243 = vadd.xlane.f32.xlu0 %v1659_v10 }
 0x487   :  { %v1244_v11 = vpop.xlane.xlu0 %1243 }
 0x488   :  { %1660 = vrcp.f32 %v1244_v11 }
 0x492   :  { %v1661_v12 = vpop.eup %1660 }
 0x493   :  { %v1246_v13 = vmul.f32 %v1661_v12, %v1659_v10 }
 0x495   :  { %1248 = vst.msk [vmem:[#allocation10] sm:$0xff] %vm1247_vm0, %v1246_v13 }
 0x496   :  { %1761 = shalt.err (!%p1758_p8)
}
 0x497   :  { %s1762_s12 = scalar_lea.hbm %s1935_s7, 128 }
 0x498   :  { %p1763_p9 = scmp.ne.s32.totalorder %s1935_s7, %s1762_s12  ;;  %p1766_p10 = scmp.lt.u32.totalorder %s1762_s12, %s1935_s7 }
 0x49a   :  { %p1768_p11 = pnand %p1766_p10, %p1763_p9 }
 0x49c   :  { %1771 = shalt.err (!%p1768_p11)
}
 0x49d   :  { %1258 = dma.vmem_to_hbm [thread:$0]  %s1256_s9, 128, %s1935_s7, [#allocation4]  }
 0x49e   :  { %1778 = dma.done.wait [#allocation4], 128  }
 0x49f   :  { %1779 = vsyncadd [#allocation4], 4294967168 }
 0x4a0   :  { %1262 = vsyncpa [#allocation3], 1 }
 0x4a1   :  { %1263 = vsyncpa [#allocation6], 1 }
 0x4a2   :  { %1264 = vsyncpa [#allocation9], 1 }
 0x4a3   :  { %1265 = vsyncpa [#allocation4], 1 }

</bundles_post_ra>
